<compile_context>
chip_gen: v5e
topology: v5e:2x2
jax: 0.10.0
libtpu: 0.0.40
codegen_flags: <defaults>
</compile_context>

<pallas_src>
import jax
import jax.numpy as jnp
from jax.experimental import pallas as pl
from jax.experimental.pallas import tpu as pltpu


def _round_up(x, m):
    return ((x + m - 1) // m) * m


def _vmem_budget_bytes():
    """~75% of physical VMEM; conservative 48 MiB fallback (v7x has only 64 MiB)."""
    try:
        info = pltpu.get_tpu_info()
        cap = int(getattr(info, "vmem_capacity_bytes", 0) or 0)
        if cap > 0:
            return (cap * 3) // 4
    except Exception:
        pass
    return 48 * 1024 * 1024


# --------------------------------- kernels ----------------------------------

def _lm_head_kernel_2d(z_ref, w_ref, b_ref, o_ref):
    """K collapsed into the block: one MXU pass per (i, j) output tile."""
    acc = jnp.dot(z_ref[...], w_ref[...], preferred_element_type=jnp.float32)
    o_ref[...] = (acc + b_ref[...].astype(jnp.float32)).astype(o_ref.dtype)


def _lm_head_kernel_3d_acc(z_ref, w_ref, b_ref, o_ref, acc_ref):
    """K as innermost grid axis; f32 scratch accumulator, epilogue bias + cast."""
    k = pl.program_id(2)

    @pl.when(k == 0)
    def _():
        acc_ref[...] = jnp.zeros_like(acc_ref)

    acc_ref[...] += jnp.dot(z_ref[...], w_ref[...], preferred_element_type=jnp.float32)

    @pl.when(k == pl.num_programs(2) - 1)
    def _():
        o_ref[...] = (acc_ref[...] + b_ref[...].astype(jnp.float32)).astype(o_ref.dtype)


def _lm_head_kernel_3d_f32out(z_ref, w_ref, b_ref, o_ref):
    """f32 output: accumulate straight into the resident output tile (no scratch)."""
    k = pl.program_id(2)

    @pl.when(k == 0)
    def _():
        o_ref[...] = jnp.broadcast_to(b_ref[...], o_ref.shape).astype(jnp.float32)

    o_ref[...] += jnp.dot(z_ref[...], w_ref[...], preferred_element_type=jnp.float32)


# -------------------------------- tile planning ------------------------------

def _next_smaller(val, ladder):
    for c in ladder:
        if c < val:
            return c
    return val


def _plan_tiles(M, N, K, z_item, w_item, o_item, budget,
                tm=None, tn=None, tk=None, collapse_k=None):
    """Pick (tm, tn, tk, collapse_k).  Every chosen block dim is either the full array
    extent or (8,128)-aligned, so all BlockSpecs satisfy the TPU tiling constraint."""
    if collapse_k is None:
        collapse_k = (tk is None) and K <= 4096
    if tm is None:
        tm = M if M <= 512 else 512            # 512 = 2x256: full MXU tile (v6e/v7x)
    if tn is None:
        tn = N if N <= 1024 else 1024
    if collapse_k:
        tk = K
    elif tk is None:
        tk = min(_round_up(K, 128), 2048)      # keep tk >= 512: MXU, not vst, binding

    tm_ladder = (512, 256, 128, 64, 32, 16, 8)
    tn_ladder = (1024, 512, 256, 128)
    tk_ladder = (2048, 1024, 512)

    def footprint(tm_, tn_, tk_):
        return (2 * tm_ * tk_ * z_item         # z blocks (double-buffered)
                + 2 * tk_ * tn_ * w_item       # streamed weight blocks
                + 2 * tm_ * tn_ * o_item       # output blocks
                + 2 * tn_ * 4                  # bias
                + tm_ * tn_ * 4)               # f32 accumulator / dot temporary

    while footprint(tm, tn, tk) > budget:
        if collapse_k:
            new_tn = _next_smaller(tn, tn_ladder)
            if new_tn != tn:
                tn = new_tn
                continue
            new_tm = _next_smaller(tm, tm_ladder)
            if new_tm != tm:
                tm = new_tm
                continue
            # Cannot keep the whole K panel resident: fall back to a K grid axis.
            collapse_k = False
            tk = min(_round_up(K, 128), 2048)
            continue
        new_tk = _next_smaller(tk, tk_ladder)
        if new_tk != tk:
            tk = new_tk
            continue
        new_tn = _next_smaller(tn, tn_ladder)
        if new_tn != tn:
            tn = new_tn
            continue
        new_tm = _next_smaller(tm, tm_ladder)
        if new_tm != tm:
            tm = new_tm
            continue
        break  # smallest allowed plan; accept it
    return tm, tn, tk, collapse_k


# ---------------------------------- wrapper ----------------------------------

def frame_decoder_forward(z, w, b, *, out_dtype=None,
                          tm=None, tn=None, tk=None, collapse_k=None):
    """FrameDecoder forward: logits = lm_head(z).

    z: (B, S, K) activations; w: (K, N) == PyTorch lm_head.weight.T; b: (N,).
    Returns a 1-tuple (logits,) with logits of shape (B, S, N), matching the
    PyTorch module's `return (logits,)`.  For real lm_head sizes stream z/w in
    bfloat16 (int8 also works on v5e/v6e; on v7x use fp8 or dequantize on the VPU).
    """
    B, S, K = z.shape
    Kw, N = w.shape
    assert Kw == K, (Kw, K)
    assert b.shape == (N,), b.shape
    M = B * S
    out_dtype = jnp.dtype(z.dtype if out_dtype is None else out_dtype)

    budget = _vmem_budget_bytes()
    tm, tn, tk, collapse_k = _plan_tiles(
        M, N, K, z.dtype.itemsize, w.dtype.itemsize, out_dtype.itemsize,
        budget, tm, tn, tk, collapse_k)

    z2 = z.reshape(M, K)
    w2 = w
    b2 = b.reshape(1, N)

    n_i = pl.cdiv(M, tm)
    n_j = pl.cdiv(N, tn)

    if collapse_k:
        Kp = K
        grid = (n_i, n_j)                                   # j innermost -> z panel resident
        in_specs = [
            pl.BlockSpec((tm, K), lambda i, j: (i, 0)),     # z row-panel: one DMA per i
            pl.BlockSpec((K, tn), lambda i, j: (0, j)),     # streamed weight panel
            pl.BlockSpec((1, tn), lambda i, j: (0, j)),     # bias
        ]
        out_spec = pl.BlockSpec((tm, tn), lambda i, j: (i, j))
        kernel = _lm_head_kernel_2d
        scratch = []
        semantics = ("parallel", "parallel")
        z_streams = 1
    else:
        # K-reduction grid: pad along K only (garbage along K would corrupt real
        # outputs; ragged M/N edge tiles are masked on store and need no padding).
        Kp = _round_up(K, tk)
        if Kp != K:
            z2 = jnp.pad(z2, ((0, 0), (0, Kp - K)))
            w2 = jnp.pad(w, ((0, Kp - K), (0, 0)))
        grid = (n_i, n_j, Kp // tk)
        in_specs = [
            pl.BlockSpec((tm, tk), lambda i, j, k: (i, k)),
            pl.BlockSpec((tk, tn), lambda i, j, k: (k, j)),
            pl.BlockSpec((1, tn), lambda i, j, k: (0, j)),
        ]
        out_spec = pl.BlockSpec((tm, tn), lambda i, j, k: (i, j))
        semantics = ("parallel", "parallel", "arbitrary")
        if out_dtype == jnp.float32:
            kernel = _lm_head_kernel_3d_f32out              # accumulate into resident o tile
            scratch = []
        else:
            kernel = _lm_head_kernel_3d_acc
            scratch = [pltpu.VMEM((tm, tn), jnp.float32)]
        z_streams = n_j

    cost = pl.CostEstimate(
        flops=2 * M * N * Kp,
        transcendentals=0,
        bytes_accessed=int(M * Kp * z2.dtype.itemsize * z_streams
                           + Kp * N * w2.dtype.itemsize * n_i
                           + N * b2.dtype.itemsize * n_i
                           + M * N * out_dtype.itemsize),
    )

    logits2 = pl.pallas_call(
        kernel,
        out_shape=jax.ShapeDtypeStruct((M, N), out_dtype),
        grid_spec=pltpu.PrefetchScalarGridSpec(
            num_scalar_prefetch=0,
            grid=grid,
            in_specs=in_specs,
            out_specs=out_spec,
            scratch_shapes=scratch,
        ),
        compiler_params=pltpu.CompilerParams(
            dimension_semantics=semantics,
            vmem_limit_bytes=int(budget),
        ),
        cost_estimate=cost,
    )(z2, w2, b2)

    return (logits2.reshape(B, S, N),)


# ----------------------------------- demo ------------------------------------

if __name__ == "__main__":
    root = jax.random.PRNGKey(0)

    def run_case(name, key, batch, seq, latent_dim, num_classes,
                 in_dtype=jnp.float32, out_dtype=None, **tile_kwargs):
        kz, kw, kb = jax.random.split(key, 3)
        z = jax.random.normal(kz, (batch, seq, latent_dim), jnp.float32)
        w = jax.random.normal(kw, (latent_dim, num_classes), jnp.float32) * 0.02
        b = jax.random.normal(kb, (num_classes,), jnp.float32) * 0.1
        z_in, w_in = z.astype(in_dtype), w.astype(in_dtype)

        (logits,) = frame_decoder_forward(z_in, w_in, b, out_dtype=out_dtype, **tile_kwargs)
        logits = jax.block_until_ready(logits)

        ref = (z_in.astype(jnp.float32).reshape(-1, latent_dim)
               @ w_in.astype(jnp.float32) + b).reshape(batch, seq, num_classes)
        assert logits.shape == (batch, seq, num_classes), (name, logits.shape)
        bf16_path = (in_dtype == jnp.bfloat16) or (logits.dtype == jnp.bfloat16)
        tol = 3e-2 if bf16_path else 1e-2
        err = float(jnp.max(jnp.abs(logits.astype(jnp.float32) - ref)))
        assert jnp.allclose(logits.astype(jnp.float32), ref, atol=tol, rtol=tol), (name, err)

    keys = jax.random.split(root, 5)

    # Shapes implied by the module: latent_dim -> num_classes Linear, small config.
    # 1) f32, K collapsed -> single-tile 2D grid (main path).
    run_case("f32_2d", keys[0], batch=2, seq=8, latent_dim=32, num_classes=128)
    # 2) bf16-streamed activations/weights, f32 logits (recommended for real lm_head sizes).
    run_case("bf16_2d", keys[1], batch=2, seq=8, latent_dim=32, num_classes=128,
             in_dtype=jnp.bfloat16, out_dtype=jnp.float32)
    # 3) forced K-reduction grid, f32 output -> direct accumulation into the output tile.
    run_case("f32_3d", keys[2], batch=2, seq=8, latent_dim=512, num_classes=128,
             collapse_k=False, tk=256)
    # 4) forced K-reduction grid with K padding (500 -> 512) and bf16 output -> scratch acc.
    run_case("bf16_3d", keys[3], batch=2, seq=8, latent_dim=500, num_classes=128,
             in_dtype=jnp.bfloat16, out_dtype=jnp.bfloat16, collapse_k=False, tk=256)
    # 5) ragged M (=18) and N (=160) edges handled by masked partial tiles (no host padding).
    run_case("ragged_2d", keys[4], batch=2, seq=9, latent_dim=40, num_classes=160,
             tm=8, tn=128)

    print("KERNEL_OK")
</pallas_src>

<mosaic_0001>
module attributes {stable_mosaic.version = 11 : i64} {
  func.func @_lm_head_kernel_2d(%arg0: i32, %arg1: i32, %arg2: memref<16x32xf32, #tpu.memory_space<vmem>>, %arg3: memref<32x128xf32, #tpu.memory_space<vmem>>, %arg4: memref<1x128xf32, #tpu.memory_space<vmem>>, %arg5: memref<16x128xf32, #tpu.memory_space<vmem>>) attributes {dimension_semantics = [#tpu.dimension_semantics<parallel>, #tpu.dimension_semantics<parallel>], iteration_bounds = array<i64: 1, 1>, scalar_prefetch = 0 : i64, scratch_operands = 0 : i64, tpu.core_type = #tpu.core_type<tc>, window_params = [{transform_indices = @transform_0, window_bounds = array<i64: 16, 32>}, {transform_indices = @transform_1, window_bounds = array<i64: 32, 128>}, {transform_indices = @transform_2, window_bounds = array<i64: 1, 128>}, {transform_indices = @transform_3, window_bounds = array<i64: 16, 128>}]} {
    %c0 = arith.constant 0 : index
    %c0_0 = arith.constant 0 : index
    %0 = vector.load %arg2[%c0, %c0_0] : memref<16x32xf32, #tpu.memory_space<vmem>>, vector<16x32xf32>
    %c0_1 = arith.constant 0 : index
    %c0_2 = arith.constant 0 : index
    %1 = vector.load %arg3[%c0_1, %c0_2] : memref<32x128xf32, #tpu.memory_space<vmem>>, vector<32x128xf32>
    %cst = arith.constant dense<0.000000e+00> : vector<16x128xf32>
    %2 = tpu.matmul %0, %1, %cst {dimension_numbers = #tpu.dot_dimension_numbers<[1], [0], [0], [1], [0, 0, 1, 1], [], []>} : vector<16x32xf32>, vector<32x128xf32>, vector<16x128xf32> -> vector<16x128xf32>
    %c0_3 = arith.constant 0 : index
    %c0_4 = arith.constant 0 : index
    %3 = vector.load %arg4[%c0_3, %c0_4] : memref<1x128xf32, #tpu.memory_space<vmem>>, vector<1x128xf32>
    %4 = vector.broadcast %3 : vector<1x128xf32> to vector<16x128xf32>
    %5 = arith.addf %2, %4 : vector<16x128xf32>
    %c0_5 = arith.constant 0 : index
    %c0_6 = arith.constant 0 : index
    %6 = vector.load %arg5[%c0_5, %c0_6] : memref<16x128xf32, #tpu.memory_space<vmem>>, vector<16x128xf32>
    tpu.vector_store %arg5[%c0_5, %c0_6], %5 {strides = array<i32>} : memref<16x128xf32, #tpu.memory_space<vmem>>, vector<16x128xf32>,
    return
  }
  func.func @transform_0(%arg0: i32, %arg1: i32) -> (i32, i32) {
    %c0_i32 = arith.constant 0 : i32
    %c0_i32_0 = arith.constant 0 : i32
    return %arg0, %c0_i32 : i32, i32
  }
  func.func @transform_1(%arg0: i32, %arg1: i32) -> (i32, i32) {
    %c0_i32 = arith.constant 0 : i32
    %c0_i32_0 = arith.constant 0 : i32
    return %c0_i32, %arg1 : i32, i32
  }
  func.func @transform_2(%arg0: i32, %arg1: i32) -> (i32, i32) {
    %c0_i32 = arith.constant 0 : i32
    %c0_i32_0 = arith.constant 0 : i32
    return %c0_i32, %arg1 : i32, i32
  }
  func.func @transform_3(%arg0: i32, %arg1: i32) -> (i32, i32) {
    %c0_i32 = arith.constant 0 : i32
    return %arg0, %arg1 : i32, i32
  }
}

</mosaic_0001>

<bundles_post_ra>
// kernel: tpu_custom_call.1
= control target key start
LH: loop header
LB: loop body
LE: loop exit
PB: predicated region body
PF: predicated region fallthrough
CT: control target
= control target key end

     0   :  { %8 = vsyncpa [#allocation3], 0  ;;  %s245_s0 = inlined_call_operand.hbm [shape: f32[16,32], index: 0, kind: input, shape index: {}]   ;;  %s246_s1 = inlined_call_operand.hbm [shape: f32[32,128], index: 1, kind: input, shape index: {}]   ;;  %s247_s2 = inlined_call_operand.vmem [shape: f32[1,128], index: 2, kind: input, shape index: {}]   ;;  %s248_s3 = inlined_call_operand.hbm [shape: f32[16,128], index: 3, kind: output, shape index: {}]  }
   0x1   :  { %9 = vsyncpa [#allocation6], 0 }
   0x2   :  { %10 = vsyncpa [#allocation4], 0  ;;  %s15_s14 = sshll.u32 %s245_s0, 4  ;;  %s199_s15 = smov [#allocation2]   ;;  %s16_s14 = int_to_ptr.hbm [resolvable:$true] %s15_s14 }
   0x3   :  { %s17_s16 = sshll.u32 %s199_s15, 4  ;;  %s28_s19 = sshll.u32 %s246_s1, 4  ;;  %s18_s16 = int_to_ptr.vmem [resolvable:$true] %s17_s16  ;;  %s29_s19 = int_to_ptr.hbm [resolvable:$true] %s28_s19 }
   0x4   :  { %s200_s20 = smov 128   ;;  %s201_s21 = smov 8  }
   0x5   :  { %23 = dma.hbm_to_vmem [thread:$0]  %s16_s14, 256, %s18_s16, [#allocation3], %s200_s20, %s200_s20, %s201_s21  }
   0x6   :  { %s202_s22 = smov [#allocation5]  }
   0x7   :  { %s30_s23 = sshll.u32 %s202_s22, 4  ;;  %s31_s23 = int_to_ptr.vmem [resolvable:$true] %s30_s23 }
   0x8   :  { %36 = dma.hbm_to_vmem [thread:$0]  %s29_s19, 512, %s31_s23, [#allocation6], %s200_s20, %s200_s20, %s201_s21  }
   0x9   :  { %193 = dma.done.wait [#allocation3], 256  }
   0xa   :  { %194 = vsyncadd [#allocation3], 4294967040 }
   0xb   :  { %195 = dma.done.wait [#allocation6], 512  }
   0xc   :  { %196 = vsyncadd [#allocation6], 4294966784  ;;  %v52_v0 = vld [vmem:[#allocation5 + $0x18] sm:$0xff]  ;;  %v51_v1 = vld [vmem:[#allocation5 + $0x10] sm:$0xff]  ;;  %vm57_vm0 = vcmask 261120   ;;  %s203_s24 = smov [#allocation7]  }
   0xd   :  { %76 = vmatpush.msra.mxu0 %v52_v0  ;;  %111 = vmatpush.msra.mxu1 %v52_v0  ;;  %v50_v2 = vld [vmem:[#allocation5 + $0x8] sm:$0xff]  ;;  %v49_v3 = vld [vmem:[#allocation5] sm:$0xff]  ;;  %v47_v4 = vld [vmem:[#allocation2] sm:$0xff]  ;;  %s93_s25 = sshll.u32 %s203_s24, 4  ;;  %s95_s28 = sshll.u32 %s248_s3, 4  ;;  %s94_s25 = int_to_ptr.vmem [resolvable:$true] %s93_s25  ;;  %s96_s28 = int_to_ptr.hbm [resolvable:$true] %s95_s28 }
   0xe   :  { %v48_v5 = vld [vmem:[#allocation2 + $0x8] sm:$0xff]  ;;  %v120_v6 = vld [vmem:[%s247_s2] ss:$0 sm:$0xff] }
   0xf   :  { %77 = vmatpush.msra.mxu0 %v51_v1  ;;  %112 = vmatpush.msra.mxu1 %v51_v1 }
  0x11   :  { %78 = vmatpush.msra.mxu0 %v50_v2  ;;  %113 = vmatpush.msra.mxu1 %v50_v2 }
  0x13   :  { %79 = vmatpush.msra.mxu0 %v49_v3  ;;  %114 = vmatpush.msra.mxu1 %v49_v3 }
  0x14   :  { %109 = vmatmul.msk.f32.vlgmr.msra.gmra.mxu0 %vm57_vm0, %v47_v4  ;;  %110 = vmatmul.msk.f32.vlgmr.msra.gmra.mxu1 %vm57_vm0, %v48_v5 }
  0x91   :  { %v81_v7 = vpop.f32.mrf.mxu0  ;;  %v84_v8 = vpop.f32.mrf.mxu1 }
  0x92   :  { %v82_v9 = vadd.f32 %v120_v6, %v81_v7  ;;  %v85_v10 = vadd.f32 %v120_v6, %v84_v8 }
  0x94   :  { %87 = vst [vmem:[#allocation7] sm:$0xff] %v82_v9 }
  0x95   :  { %88 = vst [vmem:[#allocation7 + $0x8] sm:$0xff] %v85_v10 }
  0x96   :  { %101 = dma.vmem_to_hbm [thread:$0]  %s94_s25, 256, %s96_s28, [#allocation4], %s200_s20, %s200_s20, %s201_s21  }
  0x97   :  { %197 = dma.done.wait [#allocation4], 256  }
  0x98   :  { %198 = vsyncadd [#allocation4], 4294967040 }
  0x99   :  { %106 = vsyncpa [#allocation3], 1 }
  0x9a   :  { %107 = vsyncpa [#allocation6], 1 }
  0x9b   :  { %108 = vsyncpa [#allocation4], 1 }

</bundles_post_ra>
